<compile_context>
chip_gen: v7x
topology: tpu7x:2x2x1
jax: 0.10.0
libtpu: 0.0.40
codegen_flags: <defaults>
</compile_context>

<pallas_src>
import functools

import jax
import jax.numpy as jnp
from jax.experimental import pallas as pl
from jax.experimental.pallas import tpu as pltpu


# --------------------------------------------------------------------------- #
# Budget / tiling helpers
# --------------------------------------------------------------------------- #
def _vmem_limit_bytes():
    """Per-generation scoped-VMEM budget (~3/4 of physical, capped at 96 MiB).

    v7x: 64 MiB physical -> 48 MiB budget; v5e/v6e: 128 MiB -> 96 MiB budget.
    Falls back to the conservative v7x budget if the query is unavailable.
    """
    cap = 64 * 1024 * 1024
    try:
        info = pltpu.get_tpu_info()
        cap = int(getattr(info, "vmem_capacity_bytes", cap))
    except Exception:
        pass
    return int(min(96 * 1024 * 1024, (cap * 3) // 4))


def _pick_tile(total, max_tile, align):
    """Largest divisor of `total` that is <= max_tile, preferring multiples of
    `align` (lane/sublane-dense). Falls back to any divisor, then full extent
    (a full-extent block is always legal)."""
    limit = max(1, min(total, max_tile))
    best_aligned = None
    best_any = None
    for t in range(1, limit + 1):
        if total % t == 0:
            best_any = t
            if t % align == 0:
                best_aligned = t
    if best_aligned is not None:
        return best_aligned
    if best_any is not None:
        return best_any
    return total


def _spatial_sum(x_ref):
    """Spatial sum of the current (1, C, hw) block -> (C, 1) f32.

    f32 inputs: exact VPU/XLU lane reduction.
    bf16 (or narrower) inputs: MXU ones-matmul (native sub-f32 consumption,
    f32 accumulation, no elementwise upcast of the slab).
    """
    x = x_ref[0]                                   # (C, hw)
    if x.dtype == jnp.float32:
        return jnp.sum(x, axis=1, keepdims=True)   # (C, 1) f32
    ones = jnp.ones((x.shape[1], 1), dtype=x.dtype)
    return jnp.dot(x, ones, preferred_element_type=jnp.float32)


def _gate_from_pooled(pooled, w0_ref, b0_ref, w1_ref, b1_ref, out_dtype):
    """pooled: (C,1) f32 (already mean-scaled) -> gate (C,1) in out_dtype."""
    h = jnp.dot(w0_ref[...], pooled, preferred_element_type=jnp.float32) + b0_ref[...]
    h = jnp.maximum(h, 0.0)                        # activation = ReLU
    g = jnp.dot(w1_ref[...], h, preferred_element_type=jnp.float32) + b1_ref[...]
    return (jax.nn.sigmoid(g) * 2.0).astype(out_dtype)


# --------------------------------------------------------------------------- #
# Kernels
# --------------------------------------------------------------------------- #
def _fused_kernel(x_ref, w0_ref, b0_ref, w1_ref, b1_ref, o_ref, *, inv_hw):
    # x_ref / o_ref: (1, C, HW) per-batch slabs resident in VMEM.
    pooled = _spatial_sum(x_ref) * inv_hw                              # (C, 1) f32
    gate = _gate_from_pooled(pooled, w0_ref, b0_ref, w1_ref, b1_ref,
                             x_ref.dtype)                              # (C, 1)
    o_ref[0] = (gate * x_ref[0]).astype(o_ref.dtype)                   # (C, HW)


def _pool_gate_kernel(x_ref, w0_ref, b0_ref, w1_ref, b1_ref, gate_ref, acc_ref,
                      *, inv_hw):
    t = pl.program_id(1)

    @pl.when(t == 0)
    def _():
        acc_ref[...] = jnp.zeros_like(acc_ref)

    # x_ref: (1, C, hw_tile); accumulate the spatial sum in a (C,1) f32 scratch.
    acc_ref[...] += _spatial_sum(x_ref)

    @pl.when(t == pl.num_programs(1) - 1)
    def _():
        pooled = acc_ref[...] * inv_hw
        gate_ref[0] = _gate_from_pooled(pooled, w0_ref, b0_ref, w1_ref, b1_ref,
                                        gate_ref.dtype)


def _scale_kernel(gate_ref, x_ref, o_ref):
    # gate_ref: (r_tile, 1) in x.dtype; x_ref / o_ref: (r_tile, hw_tile).
    o_ref[...] = (gate_ref[...] * x_ref[...]).astype(o_ref.dtype)


# --------------------------------------------------------------------------- #
# Wrapper
# --------------------------------------------------------------------------- #
def squeeze_excite(x, w0, b0, w1, b1, *, force_two_phase=False):
    """NFNet SqueezeExcite forward (activation = ReLU).

    x: (N, C, H, W); w0: (hidden, C); b0: (hidden,); w1: (C, hidden); b1: (C,).
    Weights keep their native (PyTorch Conv2d 1x1) orientation and dtype.
    """
    N, C, H, W = x.shape
    HW = H * W
    hidden = w0.shape[0]
    itemsize = x.dtype.itemsize
    inv_hw = 1.0 / float(HW)

    vmem_limit = _vmem_limit_bytes()
    blk_budget = max(128 * 128 * itemsize, vmem_limit // 6)

    x3 = x.reshape(N, C, HW)
    # Biases as tiny f32 column vectors (FC math stays in f32); weights native.
    b0c = b0.reshape(hidden, 1).astype(jnp.float32)
    b1c = b1.reshape(C, 1).astype(jnp.float32)

    w_bytes = (w0.size * w0.dtype.itemsize + w1.size * w1.dtype.itemsize
               + (hidden + C) * 4)
    slab_bytes = C * HW * itemsize

    # Fused path needs in+out slabs double-buffered (+1 slab of headroom) plus
    # weights inside the scoped-VMEM budget.
    use_fused = (not force_two_phase) and \
        (5 * slab_bytes + 2 * w_bytes) <= (vmem_limit * 3) // 4

    if use_fused:
        # -------- Single-pass fused: read x once, write out once. --------
        # NOTE: on v7x the only 'parallel' axis is N, so N=1 runs on one of
        # the two TensorCores; acceptable since the op stays HBM-bound.
        out3 = pl.pallas_call(
            functools.partial(_fused_kernel, inv_hw=inv_hw),
            out_shape=jax.ShapeDtypeStruct((N, C, HW), x.dtype),
            grid_spec=pltpu.PrefetchScalarGridSpec(
                num_scalar_prefetch=0,
                grid=(N,),
                in_specs=[
                    pl.BlockSpec((1, C, HW), lambda n: (n, 0, 0)),   # x slab
                    pl.BlockSpec((hidden, C), lambda n: (0, 0)),     # w0
                    pl.BlockSpec((hidden, 1), lambda n: (0, 0)),     # b0
                    pl.BlockSpec((C, hidden), lambda n: (0, 0)),     # w1
                    pl.BlockSpec((C, 1), lambda n: (0, 0)),          # b1
                ],
                out_specs=pl.BlockSpec((1, C, HW), lambda n: (n, 0, 0)),
            ),
            compiler_params=pltpu.CompilerParams(
                dimension_semantics=("parallel",),
                vmem_limit_bytes=vmem_limit,
            ),
            cost_estimate=pl.CostEstimate(
                flops=3 * N * C * HW + 4 * N * C * hidden,
                transcendentals=N * C,
                bytes_accessed=2 * N * C * HW * itemsize + w_bytes,
            ),
        )(x3, w0, b0c, w1, b1c)
        return out3.reshape(N, C, H, W)

    # ---------------- Phase 1: pooled sum + gate (reads x once) ----------------
    max_hw1 = max(128, min(16384, blk_budget // max(1, C * itemsize)))
    hw_t1 = _pick_tile(HW, max_hw1, 128)

    gate = pl.pallas_call(
        functools.partial(_pool_gate_kernel, inv_hw=inv_hw),
        out_shape=jax.ShapeDtypeStruct((N, C, 1), x.dtype),
        grid_spec=pltpu.PrefetchScalarGridSpec(
            num_scalar_prefetch=0,
            grid=(N, HW // hw_t1),
            in_specs=[
                pl.BlockSpec((1, C, hw_t1), lambda n, t: (n, 0, t)),  # x tile
                pl.BlockSpec((hidden, C), lambda n, t: (0, 0)),       # w0
                pl.BlockSpec((hidden, 1), lambda n, t: (0, 0)),       # b0
                pl.BlockSpec((C, hidden), lambda n, t: (0, 0)),       # w1
                pl.BlockSpec((C, 1), lambda n, t: (0, 0)),            # b1
            ],
            out_specs=pl.BlockSpec((1, C, 1), lambda n, t: (n, 0, 0)),
            scratch_shapes=[pltpu.VMEM((C, 1), jnp.float32)],
        ),
        compiler_params=pltpu.CompilerParams(
            dimension_semantics=("parallel", "arbitrary"),
            vmem_limit_bytes=vmem_limit,
        ),
        cost_estimate=pl.CostEstimate(
            flops=2 * N * C * HW + 4 * N * C * hidden,
            transcendentals=N * C,
            bytes_accessed=N * C * HW * itemsize + N * C * itemsize + w_bytes,
        ),
    )(x3, w0, b0c, w1, b1c)

    # ---------------- Phase 2: out = gate * x, fully parallel tiles ----------------
    R = N * C
    x2 = x3.reshape(R, HW)                 # lane-dense HW on the last axis
    gate2 = gate.reshape(R, 1)             # gate already in x.dtype

    sub_align = 8 * max(1, 4 // itemsize)  # 8 f32, 16 bf16, 32 int8/fp8
    hw_t2 = _pick_tile(HW, 4096, 128)
    r_budget = max(sub_align, blk_budget // max(1, hw_t2 * itemsize))
    r_t = _pick_tile(R, min(1024, r_budget), sub_align)

    out2 = pl.pallas_call(
        _scale_kernel,
        out_shape=jax.ShapeDtypeStruct((R, HW), x.dtype),
        grid_spec=pltpu.PrefetchScalarGridSpec(
            num_scalar_prefetch=0,
            grid=(R // r_t, HW // hw_t2),
            in_specs=[
                pl.BlockSpec((r_t, 1), lambda i, j: (i, 0)),       # gate rows
                pl.BlockSpec((r_t, hw_t2), lambda i, j: (i, j)),   # x tile
            ],
            out_specs=pl.BlockSpec((r_t, hw_t2), lambda i, j: (i, j)),
        ),
        compiler_params=pltpu.CompilerParams(
            dimension_semantics=("parallel", "parallel"),
            vmem_limit_bytes=vmem_limit,
        ),
        cost_estimate=pl.CostEstimate(
            flops=R * HW,
            transcendentals=0,
            bytes_accessed=2 * R * HW * itemsize + R * itemsize,
        ),
    )(gate2, x2)

    return out2.reshape(N, C, H, W)


# --------------------------------------------------------------------------- #
# Reference + self-test
# --------------------------------------------------------------------------- #
def _reference(x, w0, b0, w1, b1):
    xf = x.astype(jnp.float32)
    pooled = jnp.mean(xf, axis=(2, 3), keepdims=True)                 # (N,C,1,1)
    h = jnp.einsum('oc,ncxy->noxy', w0.astype(jnp.float32), pooled) \
        + b0.astype(jnp.float32)[None, :, None, None]
    h = jnp.maximum(h, 0.0)
    g = jnp.einsum('co,noxy->ncxy', w1.astype(jnp.float32), h) \
        + b1.astype(jnp.float32)[None, :, None, None]
    return jax.nn.sigmoid(g) * 2.0 * xf


if __name__ == "__main__":
    key = jax.random.PRNGKey(0)
    N, C, H, W = 2, 4, 16, 16
    ratio = 0.5
    hidden = max(1, int(C * ratio))

    k_x, k_w0, k_b0, k_w1, k_b1 = jax.random.split(key, 5)
    x = jax.random.normal(k_x, (N, C, H, W), dtype=jnp.float32)
    # Deterministic synthetic parameters (Conv2d 1x1 weights squeezed to 2D).
    w0 = 0.3 * jax.random.normal(k_w0, (hidden, C), dtype=jnp.float32)
    b0 = 0.1 * jax.random.normal(k_b0, (hidden,), dtype=jnp.float32)
    w1 = 0.3 * jax.random.normal(k_w1, (C, hidden), dtype=jnp.float32)
    b1 = 0.1 * jax.random.normal(k_b1, (C,), dtype=jnp.float32)

    ref = _reference(x, w0, b0, w1, b1)

    # 1) Fused single-pass path (default for this slab size).
    out_fused = jax.block_until_ready(squeeze_excite(x, w0, b0, w1, b1))
    assert out_fused.shape == (N, C, H, W)
    assert jnp.allclose(out_fused, ref, atol=1e-5, rtol=1e-5), "fused path mismatch"

    # 2) Two-phase fallback path (forced, exercises the large-slab code).
    out_tp = jax.block_until_ready(
        squeeze_excite(x, w0, b0, w1, b1, force_two_phase=True))
    assert jnp.allclose(out_tp, ref, atol=1e-5, rtol=1e-5), "two-phase path mismatch"

    # 3) Non-128-aligned spatial extent (HW = 49) through the fused path.
    x7 = jax.random.normal(k_x, (N, C, 7, 7), dtype=jnp.float32)
    out7 = jax.block_until_ready(squeeze_excite(x7, w0, b0, w1, b1))
    assert jnp.allclose(out7, _reference(x7, w0, b0, w1, b1),
                        atol=1e-5, rtol=1e-5), "HW=49 mismatch"

    # 4) bf16 activations/weights (native bf16 MXU pool + bf16 scale multiply).
    xb = x.astype(jnp.bfloat16)
    w0b, w1b = w0.astype(jnp.bfloat16), w1.astype(jnp.bfloat16)
    outb = jax.block_until_ready(squeeze_excite(xb, w0b, b0, w1b, b1))
    refb = _reference(xb, w0b, b0, w1b, b1)
    assert jnp.allclose(outb.astype(jnp.float32), refb,
                        atol=5e-2, rtol=5e-2), "bf16 mismatch"

    print("KERNEL_OK")
</pallas_src>

<mosaic_0001>
module attributes {stable_mosaic.version = 11 : i64} {
  func.func @_fused_kernel(%arg0: i32, %arg1: memref<1x4x256xf32, #tpu.memory_space<vmem>>, %arg2: memref<2x4xf32, #tpu.memory_space<vmem>>, %arg3: memref<2x1xf32, #tpu.memory_space<vmem>>, %arg4: memref<4x2xf32, #tpu.memory_space<vmem>>, %arg5: memref<4x1xf32, #tpu.memory_space<vmem>>, %arg6: memref<1x4x256xf32, #tpu.memory_space<vmem>>) attributes {dimension_semantics = [#tpu.dimension_semantics<parallel>], iteration_bounds = array<i64: 2>, scalar_prefetch = 0 : i64, scratch_operands = 0 : i64, tpu.core_type = #tpu.core_type<tc>, window_params = [{transform_indices = @transform_0, window_bounds = array<i64: 1, 4, 256>}, {pipeline_mode = #tpu.pipeline_mode<synchronous>, transform_indices = @transform_1, window_bounds = array<i64: 2, 4>}, {pipeline_mode = #tpu.pipeline_mode<synchronous>, transform_indices = @transform_2, window_bounds = array<i64: 2, 1>}, {pipeline_mode = #tpu.pipeline_mode<synchronous>, transform_indices = @transform_3, window_bounds = array<i64: 4, 2>}, {pipeline_mode = #tpu.pipeline_mode<synchronous>, transform_indices = @transform_4, window_bounds = array<i64: 4, 1>}, {transform_indices = @transform_5, window_bounds = array<i64: 1, 4, 256>}]} {
    %c0 = arith.constant 0 : index
    %c0_0 = arith.constant 0 : index
    %c0_1 = arith.constant 0 : index
    %0 = vector.load %arg1[%c0, %c0_0, %c0_1] : memref<1x4x256xf32, #tpu.memory_space<vmem>>, vector<1x4x256xf32>
    %1 = vector.shape_cast %0 : vector<1x4x256xf32> to vector<4x256xf32>
    %cst = arith.constant dense<0.000000e+00> : vector<4xf32>
    %2 = vector.multi_reduction <add>, %1, %cst [1] : vector<4x256xf32> to vector<4xf32>
    %3 = vector.shape_cast %2 : vector<4xf32> to vector<4x1xf32>
    %cst_2 = arith.constant 3.906250e-03 : f32
    %4 = vector.broadcast %cst_2 : f32 to vector<4x1xf32>
    %5 = arith.mulf %3, %4 : vector<4x1xf32>
    %c0_3 = arith.constant 0 : index
    %c0_4 = arith.constant 0 : index
    %6 = vector.load %arg2[%c0_3, %c0_4] : memref<2x4xf32, #tpu.memory_space<vmem>>, vector<2x4xf32>
    %cst_5 = arith.constant dense<0.000000e+00> : vector<2x1xf32>
    %7 = tpu.matmul %6, %5, %cst_5 {dimension_numbers = #tpu.dot_dimension_numbers<[1], [0], [0], [1], [0, 0, 1, 1], [], []>} : vector<2x4xf32>, vector<4x1xf32>, vector<2x1xf32> -> vector<2x1xf32>
    %c0_6 = arith.constant 0 : index
    %c0_7 = arith.constant 0 : index
    %8 = vector.load %arg3[%c0_6, %c0_7] : memref<2x1xf32, #tpu.memory_space<vmem>>, vector<2x1xf32>
    %9 = arith.addf %7, %8 : vector<2x1xf32>
    %cst_8 = arith.constant 0.000000e+00 : f32
    %10 = vector.broadcast %cst_8 : f32 to vector<2x1xf32>
    %11 = arith.maximumf %9, %10 : vector<2x1xf32>
    %c0_9 = arith.constant 0 : index
    %c0_10 = arith.constant 0 : index
    %12 = vector.load %arg4[%c0_9, %c0_10] : memref<4x2xf32, #tpu.memory_space<vmem>>, vector<4x2xf32>
    %cst_11 = arith.constant dense<0.000000e+00> : vector<4x1xf32>
    %13 = tpu.matmul %12, %11, %cst_11 {dimension_numbers = #tpu.dot_dimension_numbers<[1], [0], [0], [1], [0, 0, 1, 1], [], []>} : vector<4x2xf32>, vector<2x1xf32>, vector<4x1xf32> -> vector<4x1xf32>
    %c0_12 = arith.constant 0 : index
    %c0_13 = arith.constant 0 : index
    %14 = vector.load %arg5[%c0_12, %c0_13] : memref<4x1xf32, #tpu.memory_space<vmem>>, vector<4x1xf32>
    %15 = arith.addf %13, %14 : vector<4x1xf32>
    %16 = arith.negf %15 : vector<4x1xf32>
    %17 = math.exp %16 : vector<4x1xf32>
    %cst_14 = arith.constant 1.000000e+00 : f32
    %18 = vector.broadcast %cst_14 : f32 to vector<4x1xf32>
    %19 = arith.addf %18, %17 : vector<4x1xf32>
    %20 = arith.divf %18, %19 : vector<4x1xf32>
    %cst_15 = arith.constant 2.000000e+00 : f32
    %21 = vector.broadcast %cst_15 : f32 to vector<4x1xf32>
    %22 = arith.mulf %20, %21 : vector<4x1xf32>
    %c0_16 = arith.constant 0 : index
    %c0_17 = arith.constant 0 : index
    %c0_18 = arith.constant 0 : index
    %23 = vector.load %arg1[%c0_16, %c0_17, %c0_18] : memref<1x4x256xf32, #tpu.memory_space<vmem>>, vector<1x4x256xf32>
    %24 = vector.shape_cast %23 : vector<1x4x256xf32> to vector<4x256xf32>
    %25 = vector.broadcast %22 : vector<4x1xf32> to vector<4x256xf32>
    %26 = arith.mulf %25, %24 : vector<4x256xf32>
    %c0_19 = arith.constant 0 : index
    %c0_20 = arith.constant 0 : index
    %c0_21 = arith.constant 0 : index
    %27 = vector.load %arg6[%c0_19, %c0_20, %c0_21] : memref<1x4x256xf32, #tpu.memory_space<vmem>>, vector<1x4x256xf32>
    %28 = vector.shape_cast %27 : vector<1x4x256xf32> to vector<4x256xf32>
    %29 = vector.shape_cast %26 : vector<4x256xf32> to vector<1x4x256xf32>
    tpu.vector_store %arg6[%c0_19, %c0_20, %c0_21], %29 {strides = array<i32>} : memref<1x4x256xf32, #tpu.memory_space<vmem>>, vector<1x4x256xf32>,
    return
  }
  func.func @transform_0(%arg0: i32) -> (i32, i32, i32) {
    %c0_i32 = arith.constant 0 : i32
    %c0_i32_0 = arith.constant 0 : i32
    %c0_i32_1 = arith.constant 0 : i32
    return %arg0, %c0_i32, %c0_i32_0 : i32, i32, i32
  }
  func.func @transform_1(%arg0: i32) -> (i32, i32) {
    %c0_i32 = arith.constant 0 : i32
    %c0_i32_0 = arith.constant 0 : i32
    %c0_i32_1 = arith.constant 0 : i32
    return %c0_i32, %c0_i32_0 : i32, i32
  }
  func.func @transform_2(%arg0: i32) -> (i32, i32) {
    %c0_i32 = arith.constant 0 : i32
    %c0_i32_0 = arith.constant 0 : i32
    %c0_i32_1 = arith.constant 0 : i32
    return %c0_i32, %c0_i32_0 : i32, i32
  }
  func.func @transform_3(%arg0: i32) -> (i32, i32) {
    %c0_i32 = arith.constant 0 : i32
    %c0_i32_0 = arith.constant 0 : i32
    %c0_i32_1 = arith.constant 0 : i32
    return %c0_i32, %c0_i32_0 : i32, i32
  }
  func.func @transform_4(%arg0: i32) -> (i32, i32) {
    %c0_i32 = arith.constant 0 : i32
    %c0_i32_0 = arith.constant 0 : i32
    %c0_i32_1 = arith.constant 0 : i32
    return %c0_i32, %c0_i32_0 : i32, i32
  }
  func.func @transform_5(%arg0: i32) -> (i32, i32, i32) {
    %c0_i32 = arith.constant 0 : i32
    %c0_i32_0 = arith.constant 0 : i32
    %c0_i32_1 = arith.constant 0 : i32
    return %arg0, %c0_i32, %c0_i32_0 : i32, i32, i32
  }
}

</mosaic_0001>

<bundles_post_ra>
// kernel: tpu_custom_call.1
= control target key start
LH: loop header
LB: loop body
LE: loop exit
PB: predicated region body
PF: predicated region fallthrough
CT: control target
= control target key end

     0   :  { %10 = vsyncpa [#allocation3], 0  ;;  %s919_s0 = inlined_call_operand.hbm [shape: f32[2,4,256], index: 0, kind: input, shape index: {}]   ;;  %s920_s1 = inlined_call_operand.vmem [shape: f32[2,4], index: 1, kind: input, shape index: {}]   ;;  %s921_s2 = inlined_call_operand.vmem [shape: f32[2,1], index: 2, kind: input, shape index: {}]   ;;  %s922_s3 = inlined_call_operand.vmem [shape: f32[4,2], index: 3, kind: input, shape index: {}]   ;;  %s923_s4 = inlined_call_operand.vmem [shape: f32[4,1], index: 4, kind: input, shape index: {}]   ;;  %s924_s5 = inlined_call_operand.hbm [shape: f32[2,4,256], index: 5, kind: output, shape index: {}]  }
   0x1   :  { %12 = vsyncpa [#allocation3 + $0x1], 0 }
   0x2   :  { %13 = vsyncpa [#allocation4], 0 }
   0x3   :  { %15 = vsyncpa [#allocation4 + $0x1], 0  ;;  %s739_s18 = smov 0   ;;  %s741_s19 = smov 0  }
   0x4   :  { %s743_s20 = smov 0   ;;  %s745_s21 = smov 0  }
   0x5 LB: > { %s760_s22 = sadd.s32 4294967295, %s702_s21   ;;  %s516_s23 = sadd.s32 4294967294, %s702_s21   ;;  %s702_s21 = sphi %s745_s21, %s939_s21   ;;  %s698_s20 = sphi %s743_s20, %s938_s20   ;;  %s694_s19 = sphi %s741_s19, %s937_s19   ;;  %s690_s18 = sphi %s739_s18, %s936_s18  }
   0x6   : > { %s764_s24 = sadd.s32 1, %s702_s21   ;;  %s28_s25 = sadd.s32 1, %s698_s20 }
   0x7   : > { %s25_s26 = ssub.s32 %s702_s21, %s764_s24  ;;  %p35_p0 = scmp.ne.s32.totalorder %s698_s20, %s694_s19 }
   0x8   : > { %p26_p1 = scmp.eq.s32.totalorder %s25_s26, 0  ;;  %p36_p2 = scmp.eq.s32.totalorder %s702_s21, 0 }
   0x9   : > { %p41_p3 = scmp.ne.s32.totalorder %s694_s19, %s690_s18  ;;  %p42_p4 = scmp.eq.s32.totalorder %s760_s22, 0 }
   0xa   : > { %s776_s27 = scalar_select %p26_p1, %s698_s20, %s28_s25  }
   0xb   : > { %p778_p5 = por %p36_p2, %p35_p0  ;;  %p782_p6 = por %p42_p4, %p41_p3 }
   0xc   : > { %p149_p7 = scmp.eq.s32.totalorder %s760_s22, 1  ;;  %p155_p8 = scmp.eq.s32.totalorder %s516_s23, 1 }
   0xd   : > { %p563_p10 = scmp.lt.s32.totalorder %s702_s21, 2  ;;  %s187_s7 = sand.u32 1, %s698_s20  }
   0xe   : > { %p789_p11 = por %p149_p7, %p35_p0  ;;  %p793_p12 = por %p155_p8, %p41_p3 }
   0xf   : > { %s535_s8 = sshll.u32 %s702_s21, 7  ;;  %s519_s9 = sshll.u32 %s187_s7, 3 }
  0x10   : > { %s928_s30 = scalar_select %p789_p11, 1, 0 }
  0x11   : > { %s929_s6 = scalar_select %p793_p12, 1, 0 }
  0x12   : > { %s802_s12 = scalar_lea.hbm %s919_s0, %s535_s8  ;;  %s191_s13 = scalar_lea.vmem [#allocation2], %s519_s9 }
  0x13   : > { %s199_s14 = sshll.u32 %s191_s13, 4  ;;  %p806_p13 = pnand %p563_p10, %p778_p5  ;;  %s810_s14 = int_to_ptr.vmem [resolvable:$true] %s199_s14 }
  0x14   : > { %s188_s16 = scalar_lea.sflag [#allocation3], %s187_s7  ;;  %s606_s17 = scalar_lea.hbm %s802_s12, 128 }
  0x15   : > { %p607_p2 = scmp.ne.s32.totalorder %s802_s12, %s606_s17  ;;  %p608_p3 = pneg %p806_p13 }
  0x16   : > { %s611_s26 = scalar_lea.hbm %s919_s0, 256  ;;  %p612_p5 = scmp.lt.u32.totalorder %s802_s12, %s919_s0 }
  0x17   : > { %p609_p4 = pnand %p608_p3, %p607_p2  ;;  %p613_p8 = scmp.lt.u32.totalorder %s611_s26, %s606_s17 }
  0x18   : > { %p615_p9 = scmp.lt.u32.totalorder %s606_s17, %s802_s12 }
  0x19   : > { %p610_p7 = pneg %p609_p4  ;;  %p614_p10 = por %p613_p8, %p612_p5 }
  0x1b   : > { %p616_p0 = por %p615_p9, %p614_p10 }
  0x1d   : > { %p617_p1 = pnand %p616_p0, %p610_p7 }
  0x1f   : > { %620 = shalt.err (!%p617_p1)
}
  0x20   : > { %s621_s7 = scalar_lea.vmem %s810_s14, 128  ;;  %s704_s9 = smov [#allocation2]  }
  0x21   : > { %p622_p2 = scmp.ne.s32.totalorder %s810_s14, %s621_s7  ;;  %s626_s10 = sshll.u32 %s704_s9, 4  ;;  %s627_s10 = int_to_ptr.vmem [resolvable:$false] %s626_s10 }
  0x22   : > { %s628_s11 = scalar_lea.vmem %s627_s10, 256  ;;  %p629_p11 = scmp.lt.s32.totalorder %s810_s14, %s627_s10 }
  0x23   : > { %p624_p4 = pnand %p622_p2, %p608_p3  ;;  %p630_p5 = scmp.lt.s32.totalorder %s628_s11, %s621_s7 }
  0x25   : > { %p625_p12 = pneg %p624_p4  ;;  %p631_p8 = por %p630_p5, %p629_p11 }
  0x27   : > { %p632_p9 = pnand %p631_p8, %p625_p12 }
  0x29   : > { %635 = shalt.err (!%p632_p9)
}
  0x2a   : > { %558 = dma.hbm_to_vmem [thread:$0]  (!%p806_p13), %s802_s12, 128, %s810_s14, %s188_s16  }
  0x2b   : > { %p931_p0 = scmp.lt.s32.totalorder %s702_s21, 3  ;;  %p932_p1 = scmp.ge.s32.totalorder %s702_s21, 1 }
  0x2d   : > { %p205_p3 = pnand %p932_p1, %p931_p0 }
  0x2e   : > { %s844_s13 = sand.u32 (!%p205_p3), 1, %s694_s19  }
  0x2f   : > { %208 = sbr.rel (%p205_p3) target bundleno = 811 (0x32b), region = 40  ;;  %s523_s17 = sshll.u32 (!%p205_p3), %s844_s13, 3 }
  0x30   : > { %s211_s23 = scalar_lea.sflag (!%p205_p3), [#allocation3], %s844_s13  ;;  %s214_s15 = scalar_lea.vmem (!%p205_p3), [#allocation2], %s523_s17 }
  0x36   : > { %681 = dma.done.wait (%p782_p6), %s211_s23, 128  }
  0x37   : > { %683 = vsyncadd (%p782_p6), %s211_s23, 4294967168  ;;  %vm245_vm0 = vcmask 1043456   ;;  %v241_v0 = vld [vmem:[%s214_s15] sm:$0xff]  ;;  %v705_v5 = vmov 0.0   ;;  %vm706_vm1 = vmmov 0   ;;  %vm254_vm2 = vcmask 31744  }
  0x38   : > { %v243_v1 = vcombine.high %v241_v0, %v241_v0  ;;  %v246_v2 = vsel %vm245_vm0, %v241_v0, 0.0  ;;  %541 = vmatprep.subr.mxu0 %v705_v5  ;;  %546 = vmatprep.subr.mxu1 %v705_v5  ;;  %v252_v8 = vld [vmem:[%s920_s1] sm:$0x3]  ;;  %vm338_vm3 = vcmask 1041408   ;;  %vm334_vm4 = vcmask 15360   ;;  %s536_s7 = sshll.u32 %s760_s22, 7 }
  0x39   : > { %543 = vmatprep.mubr.msk.f32.mxu0 %vm706_vm1, %v705_v5  ;;  %548 = vmatprep.mubr.msk.f32.mxu1 %vm706_vm1, %v705_v5  ;;  %v253_v9 = vld [vmem:[%s921_s2] sm:$0x3]  ;;  %v707_v15 = vmov 0   ;;  %s240_s9 = scalar_lea.vmem [#allocation5], %s523_s17  ;;  %s875_s15 = scalar_lea.hbm %s924_s5, %s536_s7 }
  0x3a   : > { %v247_v3 = vsel %vm245_vm0, %v243_v1, 0.0  ;;  %v332_v14 = vld [vmem:[%s922_s3] sm:$0xf]  ;;  %600 = vset.pattern.permute.xlu0 %v707_v15  ;;  %s446_s10 = sshll.u32 %s240_s9, 4  ;;  %s432_s12 = scalar_lea.sflag [#allocation4], %s844_s13  ;;  %s877_s10 = int_to_ptr.vmem [resolvable:$true] %s446_s10 }
  0x3b   : > { %v248_v4 = vadd.f32 %v247_v3, %v246_v2  ;;  %v333_v16 = vld [vmem:[%s923_s4] sm:$0xf]  ;;  %s636_s29 = scalar_lea.vmem %s877_s10, 128  ;;  %p933_p11 = scmp.ne.s32.totalorder %s928_s30, 0 }
  0x3c   : > { %p637_p6 = scmp.ne.s32.totalorder %s877_s10, %s636_s29  ;;  %s708_s22 = smov [#allocation5]  }
  0x3d   : > { %249 = vadd.xlane.f32.xlu0 %v248_v4  ;;  %s640_s17 = sshll.u32 %s708_s22, 4  ;;  %s641_s17 = int_to_ptr.vmem [resolvable:$false] %s640_s17 }
  0x3e   : > { %p638_p12 = pnand %p637_p6, %p933_p11  ;;  %s642_s14 = scalar_lea.vmem %s641_s17, 256 }
  0x3f   : > { %p643_p7 = scmp.lt.s32.totalorder %s877_s10, %s641_s17  ;;  %p644_p10 = scmp.lt.s32.totalorder %s642_s14, %s636_s29 }
  0x40   : > { %p639_p13 = pneg %p638_p12 }
  0x41   : > { %p645_p2 = por %p644_p10, %p643_p7 }
  0x43   : > { %p646_p4 = pnand %p645_p2, %p639_p13 }
  0xca   : > { %v250_v6 = vpop.xlane.xlu0 %249 }
  0xcb   : > { %v251_v7 = vmul.f32 0.00390625, %v250_v6 }
  0xcd   : > { %542 = vmatpush3.msk.msra.mxu0 %vm245_vm0, %v251_v7 }
  0xce   : > { %544 = vmatmul.mubr.msk.f32.vlgmr.msra.gmra.mrb[0].mxu0 %vm254_vm2, %v252_v8 }
 0x1a1   : > { %v327_v10 = vpop.f32.mrb[0].mxu0 }
 0x1a2   : > { %v328_v11 = vadd.f32 %v327_v10, %v253_v9  ;;  %v545_v12 = vpop.f32.mrb[1].mxu0 }
 0x1a4   : > { %v331_v13 = vmax.f32 %v328_v11, 0.0 }
 0x1a6   : > { %547 = vmatpush3.msk.msra.mxu1 %vm338_vm3, %v331_v13 }
 0x1a7   : > { %549 = vmatmul.mubr.msk.f32.vlgmr.msra.gmra.mrb[0].mxu1 %vm334_vm4, %v332_v14 }
 0x27a   : > { %v408_v17 = vpop.f32.mrb[0].mxu1 }
 0x27b   : > { %v409_v18 = vadd.f32 %v408_v17, %v333_v16  ;;  %v550_v19 = vpop.f32.mrb[1].mxu1 }
 0x27d   : > { %v529_v20 = vmul.f32 -1.442695, %v409_v18 }
 0x27f   : > { %602 = vpow2.f32 %v529_v20 }
 0x289   : > { %v603_v21 = vpop.eup %602 }
 0x28a   : > { %v415_v22 = vadd.f32 1.0, %v603_v21 }
 0x28c   : > { %604 = vrcp.f32 %v415_v22 }
 0x296   : > { %v605_v23 = vpop.eup %604 }
 0x297   : > { %v418_v24 = vmul.f32 2.0, %v605_v23 }
 0x299   : > { %421 = vperm.xlu0 %600, %v418_v24  }
 0x318   : > { %v422_v25 = vpop.permute.xlu0 %421 }
 0x319   : > { %v424_v26 = vmul.f32 %v422_v25, %v241_v0  ;;  %v425_v27 = vmul.f32 %v422_v25, %v243_v1 }
 0x31b   : > { %v428_v28 = vcombine.low %v424_v26, %v425_v27 }
 0x31d   : > { %430 = vst [vmem:[%s240_s9] sm:$0xff] %v428_v28 }
 0x31e   : > { %649 = shalt.err (!%p646_p4)
}
 0x31f   : > { %s650_s13 = scalar_lea.hbm %s875_s15, 128  ;;  %s654_s26 = scalar_lea.hbm %s924_s5, 256 }
 0x320   : > { %p651_p5 = scmp.ne.s32.totalorder %s875_s15, %s650_s13  ;;  %p655_p0 = scmp.lt.u32.totalorder %s875_s15, %s924_s5 }
 0x321   : > { %p656_p1 = scmp.lt.u32.totalorder %s654_s26, %s650_s13  ;;  %p658_p6 = scmp.lt.u32.totalorder %s650_s13, %s875_s15 }
 0x322   : > { %p652_p8 = pnand %p651_p5, %p933_p11 }
 0x323   : > { %p657_p3 = por %p656_p1, %p655_p0 }
 0x324   : > { %p653_p9 = pneg %p652_p8 }
 0x325   : > { %p659_p12 = por %p658_p6, %p657_p3 }
 0x327   : > { %p660_p13 = pnand %p659_p12, %p653_p9 }
 0x329   : > { %663 = shalt.err (!%p660_p13)
}
 0x32a   : > { %553 = dma.vmem_to_hbm [thread:$0]  (%p933_p11), %s877_s10, 128, %s875_s15, %s432_s12  }
 0x32b PF: > { %s458_s7 = sand.u32 1, %s690_s18   ;;  %p934_p7 = scmp.ne.s32.totalorder %s929_s6, 0 }
 0x32c   : > { %p935_p10 = scmp.ge.s32.totalorder %s702_s21, 2  ;;  %s459_s9 = scalar_lea.sflag [#allocation4], %s458_s7 }
 0x32e   : > { %p560_p2 = pnand %p935_p10, %p934_p7 }
 0x330   : > { %685 = dma.done.wait (!%p560_p2), %s459_s9, 128  }
 0x331   : > { %687 = vsyncadd (!%p560_p2), %s459_s9, 4294967168  ;;  %p18_p4 = scmp.ge.s32.totalorder %s764_s24, 4   ;;  %s936_s18 = smov %s694_s19 }
 0x332   : > { %s937_s19 = smov %s698_s20  ;;  %s938_s20 = smov %s776_s27 }
 0x333   : > { %s939_s21 = smov %s764_s24  ;;  %20 = sbr.rel (!%p18_p4) target bundleno = 5 (0x5), region = 85 }
 0x33a   :  { %464 = vsyncpa [#allocation3], 1 }
 0x33b   :  { %466 = vsyncpa [#allocation3 + $0x1], 1 }
 0x33c   :  { %467 = vsyncpa [#allocation4], 1 }
 0x33d   :  { %469 = vsyncpa [#allocation4 + $0x1], 1 }

</bundles_post_ra>
